<compile_context>
chip_gen: v6e
topology: v6e:2x2x1
jax: 0.10.0
libtpu: 0.0.40
codegen_flags: <defaults>
</compile_context>

<pallas_src>
import jax
import jax.numpy as jnp
from jax.experimental import pallas as pl
from jax.experimental.pallas import tpu as pltpu


def _round_up(x: int, m: int) -> int:
    return (x + m - 1) // m * m


# ----------------------------------------------------------------------------
# Kernel: one grid iteration == one timestep. Weights/bias are VMEM-resident
# (constant index_map); recurrent state is carried in the constant-index
# h_last / c_last output blocks.
# ----------------------------------------------------------------------------
def _lstm_seq_kernel(x_ref, h0_ref, c0_ref, wih_ref, whh_ref, b_ref,
                     hseq_ref, hlast_ref, clast_ref):
    t = pl.program_id(0)
    hp = clast_ref.shape[-1]  # lane-padded hidden size (multiple of 128)

    @pl.when(t == 0)
    def _():
        hlast_ref[...] = h0_ref[...]
        clast_ref[...] = c0_ref[...]

    h_prev = hlast_ref[...]            # weight dtype (bf16/f32), padded width
    c_prev = clast_ref[...]            # f32, padded width

    # Two MXU matmuls into one f32 accumulator; bias folded in once.
    gates = (
        jnp.dot(x_ref[...], wih_ref[...], preferred_element_type=jnp.float32)
        + jnp.dot(h_prev, whh_ref[...], preferred_element_type=jnp.float32)
        + b_ref[...]
    )

    # i/f/o weight columns and bias were pre-scaled by 0.5 at pack time, so
    # sigmoid(z) == 0.5 * (tanh(gates) + 1) here (one EUP op per gate).
    i = 0.5 * (jnp.tanh(gates[:, 0 * hp:1 * hp]) + 1.0)
    f = 0.5 * (jnp.tanh(gates[:, 1 * hp:2 * hp]) + 1.0)
    g = jnp.tanh(gates[:, 2 * hp:3 * hp])
    o = 0.5 * (jnp.tanh(gates[:, 3 * hp:4 * hp]) + 1.0)

    c_new = f * c_prev + i * g                       # f32 cell state
    h_new = (o * jnp.tanh(c_new)).astype(hseq_ref.dtype)

    clast_ref[...] = c_new
    hlast_ref[...] = h_new
    hseq_ref[...] = h_new


# ----------------------------------------------------------------------------
# Parameter packing: call ONCE per parameter set (never in the per-step path).
# ----------------------------------------------------------------------------
def prepare_lstm_params(w_ih, w_hh, b_ih=None, b_hh=None,
                        param_dtype=jnp.bfloat16):
    """Pre-pack LSTM weights for the kernel.

    w_ih: (4*hidden, input_size), w_hh: (4*hidden, hidden)  (PyTorch Linear
    layout, gate order i, f, g, o along the leading axis).

    Returns (wih_t, whh_t, bias, hidden, h_pad, input_size):
      wih_t: (input_size, 4*h_pad)  W_ih^T, gate-padded, i/f/o cols pre-scaled 0.5
      whh_t: (h_pad,      4*h_pad)  W_hh^T, gate- and row-padded, same scaling
      bias : (1, 4*h_pad) f32       b_ih + b_hh, gate-padded, same scaling
    where h_pad = hidden rounded up to 128 (lane-dense gate / output layout).
    """
    four_h, input_size = w_ih.shape
    hidden = four_h // 4
    h_pad = _round_up(hidden, 128)

    # Fold sigmoid's 0.5 pre-activation scale into i, f, o (exact for floats).
    gate_scale = jnp.array([0.5, 0.5, 1.0, 0.5], jnp.float32).reshape(4, 1, 1)

    def _pack(w, k):
        # (4H, K) -> (4, H, K) -> scale -> pad hidden -> (K, 4, h_pad) -> (K, 4*h_pad)
        w4 = w.astype(jnp.float32).reshape(4, hidden, k) * gate_scale
        w4 = jnp.pad(w4, ((0, 0), (0, h_pad - hidden), (0, 0)))
        return jnp.transpose(w4, (2, 0, 1)).reshape(k, 4 * h_pad)

    wih_t = _pack(w_ih, input_size).astype(param_dtype)          # (in, 4*h_pad)
    whh_t = _pack(w_hh, hidden)                                  # (hidden, 4*h_pad)
    whh_t = jnp.pad(whh_t, ((0, h_pad - hidden), (0, 0))).astype(param_dtype)

    if b_ih is None:
        bias = jnp.zeros((1, 4 * h_pad), jnp.float32)
    else:
        b = (b_ih + b_hh).astype(jnp.float32).reshape(4, hidden)
        b = b * gate_scale[:, :, 0]
        bias = jnp.pad(b, ((0, 0), (0, h_pad - hidden))).reshape(1, 4 * h_pad)

    return wih_t, whh_t, bias, hidden, h_pad, input_size


# ----------------------------------------------------------------------------
# Multi-step wrapper: the whole sequence runs inside ONE pallas_call.
# ----------------------------------------------------------------------------
def lstm_cell_sequence(params, xs, state=None):
    """Run T LSTM-cell steps.

    xs: (T, B, input_size). state: optional (h_prev, c_prev), each (B, hidden).
    Returns (h_seq (T, B, hidden), (h_last, c_last) each (B, hidden)), in xs.dtype.
    """
    wih_t, whh_t, bias, hidden, h_pad, input_size = params
    T, B, _ = xs.shape
    Bp = _round_up(B, 8)                       # sublane-aligned batch
    act_dtype = wih_t.dtype
    act_bytes = jnp.dtype(act_dtype).itemsize

    # State enters padded once per sequence (h in weight dtype, c in f32) and
    # is carried at padded width inside the kernel for all T steps.
    if state is None:
        h0 = jnp.zeros((Bp, h_pad), act_dtype)
        c0 = jnp.zeros((Bp, h_pad), jnp.float32)
    else:
        h_prev, c_prev = state
        h0 = jnp.zeros((Bp, h_pad), act_dtype).at[:B, :hidden].set(
            h_prev.astype(act_dtype))
        c0 = jnp.zeros((Bp, h_pad), jnp.float32).at[:B, :hidden].set(
            c_prev.astype(jnp.float32))

    x_p = xs.astype(act_dtype)
    if Bp != B:
        x_p = jnp.pad(x_p, ((0, 0), (0, Bp - B), (0, 0)))

    # VMEM budget: weights (resident) + double-buffered x / h_seq blocks +
    # carried state + f32 gate intermediate.  Raise v5e's 16 MiB default; stay
    # within v7x's 64 MiB physical VMEM.
    weight_bytes = (input_size + h_pad) * 4 * h_pad * act_bytes + 4 * h_pad * 4
    per_step = (Bp * input_size * act_bytes
                + Bp * h_pad * act_bytes
                + Bp * 4 * h_pad * 4)
    state_bytes = 4 * Bp * h_pad * (act_bytes + 4)
    needed = weight_bytes + 2 * per_step + state_bytes
    vmem_limit = int(min(max(2 * needed + (2 << 20), 32 << 20), 64 << 20))

    h_seq_p, h_last_p, c_last_p = pl.pallas_call(
        _lstm_seq_kernel,
        out_shape=(
            jax.ShapeDtypeStruct((T, Bp, h_pad), act_dtype),   # h per step
            jax.ShapeDtypeStruct((Bp, h_pad), act_dtype),      # h_last (carry)
            jax.ShapeDtypeStruct((Bp, h_pad), jnp.float32),    # c_last (carry)
        ),
        grid_spec=pltpu.PrefetchScalarGridSpec(
            num_scalar_prefetch=0,
            grid=(T,),
            in_specs=[
                # one timestep of x per grid iteration
                pl.BlockSpec((None, Bp, input_size), lambda t: (t, 0, 0)),
                # initial state: fetched once
                pl.BlockSpec((Bp, h_pad), lambda t: (0, 0)),
                pl.BlockSpec((Bp, h_pad), lambda t: (0, 0)),
                # weights / bias: constant index -> DMA'd once, VMEM-resident
                pl.BlockSpec((input_size, 4 * h_pad), lambda t: (0, 0)),
                pl.BlockSpec((h_pad, 4 * h_pad), lambda t: (0, 0)),
                pl.BlockSpec((1, 4 * h_pad), lambda t: (0, 0)),
            ],
            out_specs=(
                pl.BlockSpec((None, Bp, h_pad), lambda t: (t, 0, 0)),
                # constant-index outputs act as the VMEM-resident recurrent carry
                pl.BlockSpec((Bp, h_pad), lambda t: (0, 0)),
                pl.BlockSpec((Bp, h_pad), lambda t: (0, 0)),
            ),
        ),
        compiler_params=pltpu.CompilerParams(
            dimension_semantics=("arbitrary",),   # sequential recurrence over T
            vmem_limit_bytes=vmem_limit,
        ),
    )(x_p, h0, c0, wih_t, whh_t, bias)

    out_dtype = xs.dtype
    h_seq = h_seq_p[:, :B, :hidden].astype(out_dtype)
    h_last = h_last_p[:B, :hidden].astype(out_dtype)
    c_last = c_last_p[:B, :hidden].astype(out_dtype)
    return h_seq, (h_last, c_last)


def lstm_cell(params, x, state=None):
    """Single LSTM cell step matching the PyTorch module's forward().

    x: (B, input_size). state: optional (h_prev, c_prev), each (B, hidden).
    Returns (h, c), each (B, hidden) in x.dtype.
    (For sequences, prefer lstm_cell_sequence: weights stay VMEM-resident.)
    """
    _, (h, c) = lstm_cell_sequence(params, x[None], state)
    return h, c


# ----------------------------------------------------------------------------
# Pure-JAX reference (mirrors the PyTorch module with float arithmetics).
# ----------------------------------------------------------------------------
def _reference_lstm_seq(xs, h, c, w_ih, w_hh, b_ih, b_hh):
    hidden = h.shape[-1]
    hs = []
    for t in range(xs.shape[0]):
        gates = xs[t] @ w_ih.T + b_ih + h @ w_hh.T + b_hh
        i = jax.nn.sigmoid(gates[:, 0 * hidden:1 * hidden])
        f = jax.nn.sigmoid(gates[:, 1 * hidden:2 * hidden])
        g = jnp.tanh(gates[:, 2 * hidden:3 * hidden])
        o = jax.nn.sigmoid(gates[:, 3 * hidden:4 * hidden])
        c = f * c + i * g
        h = o * jnp.tanh(c)
        hs.append(h)
    return jnp.stack(hs), h, c


def _make_params(key, input_size, hidden_size):
    kwih, kwhh, kbih, kbhh = jax.random.split(key, 4)
    bound_ih = 1.0 / jnp.sqrt(jnp.float32(input_size))
    bound_hh = 1.0 / jnp.sqrt(jnp.float32(hidden_size))
    w_ih = jax.random.uniform(kwih, (4 * hidden_size, input_size),
                              jnp.float32, -bound_ih, bound_ih)
    w_hh = jax.random.uniform(kwhh, (4 * hidden_size, hidden_size),
                              jnp.float32, -bound_hh, bound_hh)
    b_ih = jax.random.uniform(kbih, (4 * hidden_size,),
                              jnp.float32, -bound_ih, bound_ih)
    b_hh = jax.random.uniform(kbhh, (4 * hidden_size,),
                              jnp.float32, -bound_hh, bound_hh)
    return w_ih, w_hh, b_ih, b_hh


if __name__ == "__main__":
    key = jax.random.PRNGKey(0)
    k_small, k_big, kx_small, kx_big = jax.random.split(key, 4)

    # ---------------- Config A: f32 weights, small shapes, tight tolerance ----
    input_size, hidden_size, batch, seq_len = 16, 32, 2, 8
    w_ih, w_hh, b_ih, b_hh = _make_params(k_small, input_size, hidden_size)
    xs = jax.random.normal(kx_small, (seq_len, batch, input_size), jnp.float32)

    params_f32 = prepare_lstm_params(w_ih, w_hh, b_ih, b_hh,
                                     param_dtype=jnp.float32)
    seq_fn = jax.jit(lambda x: lstm_cell_sequence(params_f32, x))
    h_seq, (h_last, c_last) = seq_fn(xs)
    jax.block_until_ready((h_seq, h_last, c_last))

    h_seq_ref, h_ref, c_ref = _reference_lstm_seq(
        xs, jnp.zeros((batch, hidden_size)), jnp.zeros((batch, hidden_size)),
        w_ih, w_hh, b_ih, b_hh)
    assert h_seq.shape == (seq_len, batch, hidden_size)
    assert jnp.allclose(h_seq, h_seq_ref, atol=1e-4, rtol=1e-4)
    assert jnp.allclose(h_last, h_ref, atol=1e-4, rtol=1e-4)
    assert jnp.allclose(c_last, c_ref, atol=1e-4, rtol=1e-4)

    # Single-step API (module semantics): state=None then recurrent reuse.
    step0 = jax.jit(lambda x: lstm_cell(params_f32, x))
    step = jax.jit(lambda x, st: lstm_cell(params_f32, x, st))
    h1, c1 = step0(xs[0])
    h2, c2 = step(xs[1], (h1, c1))
    jax.block_until_ready((h1, c1, h2, c2))
    assert jnp.allclose(h1, h_seq_ref[0], atol=1e-4, rtol=1e-4)
    assert jnp.allclose(h2, h_seq_ref[1], atol=1e-4, rtol=1e-4)

    # ---------------- Config B: bf16 weights (default), hidden=512 ------------
    in2, hid2, b2, t2 = 64, 512, 2, 3
    w_ih2, w_hh2, b_ih2, b_hh2 = _make_params(k_big, in2, hid2)
    xs2 = jax.random.normal(kx_big, (t2, b2, in2), jnp.float32)

    params_bf16 = prepare_lstm_params(w_ih2, w_hh2, b_ih2, b_hh2)  # bf16 default
    h_seq2, (h_last2, c_last2) = jax.jit(
        lambda x: lstm_cell_sequence(params_bf16, x))(xs2)
    jax.block_until_ready((h_seq2, h_last2, c_last2))

    h_seq2_ref, h2_ref, c2_ref = _reference_lstm_seq(
        xs2, jnp.zeros((b2, hid2)), jnp.zeros((b2, hid2)),
        w_ih2, w_hh2, b_ih2, b_hh2)
    assert h_seq2.shape == (t2, b2, hid2)
    assert jnp.allclose(h_seq2, h_seq2_ref, atol=6e-2, rtol=6e-2)
    assert jnp.allclose(c_last2, c2_ref, atol=1e-1, rtol=1e-1)

    print("KERNEL_OK")
</pallas_src>

<mosaic_0001>
module attributes {stable_mosaic.version = 11 : i64} {
  func.func @_lstm_seq_kernel(%arg0: i32, %arg1: memref<1x8x16xf32, #tpu.memory_space<vmem>>, %arg2: memref<8x128xf32, #tpu.memory_space<vmem>>, %arg3: memref<8x128xf32, #tpu.memory_space<vmem>>, %arg4: memref<16x512xf32, #tpu.memory_space<vmem>>, %arg5: memref<128x512xf32, #tpu.memory_space<vmem>>, %arg6: memref<1x512xf32, #tpu.memory_space<vmem>>, %arg7: memref<1x8x128xf32, #tpu.memory_space<vmem>>, %arg8: memref<8x128xf32, #tpu.memory_space<vmem>>, %arg9: memref<8x128xf32, #tpu.memory_space<vmem>>) attributes {dimension_semantics = [#tpu.dimension_semantics<arbitrary>], iteration_bounds = array<i64: 8>, scalar_prefetch = 0 : i64, scratch_operands = 0 : i64, tpu.core_type = #tpu.core_type<tc>, window_params = [{transform_indices = @transform_0, window_bounds = array<i64: 1, 8, 16>}, {pipeline_mode = #tpu.pipeline_mode<synchronous>, transform_indices = @transform_1, window_bounds = array<i64: 8, 128>}, {pipeline_mode = #tpu.pipeline_mode<synchronous>, transform_indices = @transform_2, window_bounds = array<i64: 8, 128>}, {pipeline_mode = #tpu.pipeline_mode<synchronous>, transform_indices = @transform_3, window_bounds = array<i64: 16, 512>}, {pipeline_mode = #tpu.pipeline_mode<synchronous>, transform_indices = @transform_4, window_bounds = array<i64: 128, 512>}, {pipeline_mode = #tpu.pipeline_mode<synchronous>, transform_indices = @transform_5, window_bounds = array<i64: 1, 512>}, {transform_indices = @transform_6, window_bounds = array<i64: 1, 8, 128>}, {pipeline_mode = #tpu.pipeline_mode<synchronous>, transform_indices = @transform_7, window_bounds = array<i64: 8, 128>}, {pipeline_mode = #tpu.pipeline_mode<synchronous>, transform_indices = @transform_8, window_bounds = array<i64: 8, 128>}]} {
    %c0_i32 = arith.constant 0 : i32
    %0 = arith.cmpi eq, %arg0, %c0_i32 : i32
    %1 = arith.extui %0 : i1 to i32
    %c0_i32_0 = arith.constant 0 : i32
    %2 = arith.cmpi ne, %1, %c0_i32_0 : i32
    scf.if %2 {
      %c0_27 = arith.constant 0 : index
      %c0_28 = arith.constant 0 : index
      %45 = vector.load %arg2[%c0_27, %c0_28] : memref<8x128xf32, #tpu.memory_space<vmem>>, vector<8x128xf32>
      %c0_29 = arith.constant 0 : index
      %c0_30 = arith.constant 0 : index
      %46 = vector.load %arg8[%c0_29, %c0_30] : memref<8x128xf32, #tpu.memory_space<vmem>>, vector<8x128xf32>
      tpu.vector_store %arg8[%c0_29, %c0_30], %45 {strides = array<i32>} : memref<8x128xf32, #tpu.memory_space<vmem>>, vector<8x128xf32>,
      %c0_31 = arith.constant 0 : index
      %c0_32 = arith.constant 0 : index
      %47 = vector.load %arg3[%c0_31, %c0_32] : memref<8x128xf32, #tpu.memory_space<vmem>>, vector<8x128xf32>
      %c0_33 = arith.constant 0 : index
      %c0_34 = arith.constant 0 : index
      %48 = vector.load %arg9[%c0_33, %c0_34] : memref<8x128xf32, #tpu.memory_space<vmem>>, vector<8x128xf32>
      tpu.vector_store %arg9[%c0_33, %c0_34], %47 {strides = array<i32>} : memref<8x128xf32, #tpu.memory_space<vmem>>, vector<8x128xf32>,
    } else {
    }
    %c0 = arith.constant 0 : index
    %c0_1 = arith.constant 0 : index
    %3 = vector.load %arg8[%c0, %c0_1] : memref<8x128xf32, #tpu.memory_space<vmem>>, vector<8x128xf32>
    %c0_2 = arith.constant 0 : index
    %c0_3 = arith.constant 0 : index
    %4 = vector.load %arg9[%c0_2, %c0_3] : memref<8x128xf32, #tpu.memory_space<vmem>>, vector<8x128xf32>
    %c0_4 = arith.constant 0 : index
    %c0_5 = arith.constant 0 : index
    %c0_6 = arith.constant 0 : index
    %5 = vector.load %arg1[%c0_4, %c0_5, %c0_6] : memref<1x8x16xf32, #tpu.memory_space<vmem>>, vector<1x8x16xf32>
    %6 = vector.shape_cast %5 : vector<1x8x16xf32> to vector<8x16xf32>
    %c0_7 = arith.constant 0 : index
    %c0_8 = arith.constant 0 : index
    %7 = vector.load %arg4[%c0_7, %c0_8] : memref<16x512xf32, #tpu.memory_space<vmem>>, vector<16x512xf32>
    %cst = arith.constant dense<0.000000e+00> : vector<8x512xf32>
    %8 = tpu.matmul %6, %7, %cst {dimension_numbers = #tpu.dot_dimension_numbers<[1], [0], [0], [1], [0, 0, 1, 1], [], []>} : vector<8x16xf32>, vector<16x512xf32>, vector<8x512xf32> -> vector<8x512xf32>
    %c0_9 = arith.constant 0 : index
    %c0_10 = arith.constant 0 : index
    %9 = vector.load %arg5[%c0_9, %c0_10] : memref<128x512xf32, #tpu.memory_space<vmem>>, vector<128x512xf32>
    %cst_11 = arith.constant dense<0.000000e+00> : vector<8x512xf32>
    %10 = tpu.matmul %3, %9, %cst_11 {dimension_numbers = #tpu.dot_dimension_numbers<[1], [0], [0], [1], [0, 0, 1, 1], [], []>} : vector<8x128xf32>, vector<128x512xf32>, vector<8x512xf32> -> vector<8x512xf32>
    %11 = arith.addf %8, %10 : vector<8x512xf32>
    %c0_12 = arith.constant 0 : index
    %c0_13 = arith.constant 0 : index
    %12 = vector.load %arg6[%c0_12, %c0_13] : memref<1x512xf32, #tpu.memory_space<vmem>>, vector<1x512xf32>
    %13 = vector.broadcast %12 : vector<1x512xf32> to vector<8x512xf32>
    %14 = arith.addf %11, %13 : vector<8x512xf32>
    %15 = vector.extract_strided_slice %14 {offsets = [0, 0], sizes = [8, 128], strides = [1, 1]} : vector<8x512xf32> to vector<8x128xf32>
    %16 = math.tanh %15 : vector<8x128xf32>
    %cst_14 = arith.constant 1.000000e+00 : f32
    %17 = vector.broadcast %cst_14 : f32 to vector<8x128xf32>
    %18 = arith.addf %16, %17 : vector<8x128xf32>
    %cst_15 = arith.constant 5.000000e-01 : f32
    %19 = vector.broadcast %cst_15 : f32 to vector<8x128xf32>
    %20 = arith.mulf %19, %18 : vector<8x128xf32>
    %21 = vector.extract_strided_slice %14 {offsets = [0, 128], sizes = [8, 128], strides = [1, 1]} : vector<8x512xf32> to vector<8x128xf32>
    %22 = math.tanh %21 : vector<8x128xf32>
    %cst_16 = arith.constant 1.000000e+00 : f32
    %23 = vector.broadcast %cst_16 : f32 to vector<8x128xf32>
    %24 = arith.addf %22, %23 : vector<8x128xf32>
    %cst_17 = arith.constant 5.000000e-01 : f32
    %25 = vector.broadcast %cst_17 : f32 to vector<8x128xf32>
    %26 = arith.mulf %25, %24 : vector<8x128xf32>
    %27 = vector.extract_strided_slice %14 {offsets = [0, 256], sizes = [8, 128], strides = [1, 1]} : vector<8x512xf32> to vector<8x128xf32>
    %28 = math.tanh %27 : vector<8x128xf32>
    %29 = vector.extract_strided_slice %14 {offsets = [0, 384], sizes = [8, 128], strides = [1, 1]} : vector<8x512xf32> to vector<8x128xf32>
    %30 = math.tanh %29 : vector<8x128xf32>
    %cst_18 = arith.constant 1.000000e+00 : f32
    %31 = vector.broadcast %cst_18 : f32 to vector<8x128xf32>
    %32 = arith.addf %30, %31 : vector<8x128xf32>
    %cst_19 = arith.constant 5.000000e-01 : f32
    %33 = vector.broadcast %cst_19 : f32 to vector<8x128xf32>
    %34 = arith.mulf %33, %32 : vector<8x128xf32>
    %35 = arith.mulf %26, %4 : vector<8x128xf32>
    %36 = arith.mulf %20, %28 : vector<8x128xf32>
    %37 = arith.addf %35, %36 : vector<8x128xf32>
    %38 = math.tanh %37 : vector<8x128xf32>
    %39 = arith.mulf %34, %38 : vector<8x128xf32>
    %c0_20 = arith.constant 0 : index
    %c0_21 = arith.constant 0 : index
    %40 = vector.load %arg9[%c0_20, %c0_21] : memref<8x128xf32, #tpu.memory_space<vmem>>, vector<8x128xf32>
    tpu.vector_store %arg9[%c0_20, %c0_21], %37 {strides = array<i32>} : memref<8x128xf32, #tpu.memory_space<vmem>>, vector<8x128xf32>,
    %c0_22 = arith.constant 0 : index
    %c0_23 = arith.constant 0 : index
    %41 = vector.load %arg8[%c0_22, %c0_23] : memref<8x128xf32, #tpu.memory_space<vmem>>, vector<8x128xf32>
    tpu.vector_store %arg8[%c0_22, %c0_23], %39 {strides = array<i32>} : memref<8x128xf32, #tpu.memory_space<vmem>>, vector<8x128xf32>,
    %c0_24 = arith.constant 0 : index
    %c0_25 = arith.constant 0 : index
    %c0_26 = arith.constant 0 : index
    %42 = vector.load %arg7[%c0_24, %c0_25, %c0_26] : memref<1x8x128xf32, #tpu.memory_space<vmem>>, vector<1x8x128xf32>
    %43 = vector.shape_cast %42 : vector<1x8x128xf32> to vector<8x128xf32>
    %44 = vector.shape_cast %39 : vector<8x128xf32> to vector<1x8x128xf32>
    tpu.vector_store %arg7[%c0_24, %c0_25, %c0_26], %44 {strides = array<i32>} : memref<1x8x128xf32, #tpu.memory_space<vmem>>, vector<1x8x128xf32>,
    return
  }
  func.func @transform_0(%arg0: i32) -> (i32, i32, i32) {
    %c0_i32 = arith.constant 0 : i32
    %c0_i32_0 = arith.constant 0 : i32
    %c0_i32_1 = arith.constant 0 : i32
    return %arg0, %c0_i32, %c0_i32_0 : i32, i32, i32
  }
  func.func @transform_1(%arg0: i32) -> (i32, i32) {
    %c0_i32 = arith.constant 0 : i32
    %c0_i32_0 = arith.constant 0 : i32
    %c0_i32_1 = arith.constant 0 : i32
    return %c0_i32, %c0_i32_0 : i32, i32
  }
  func.func @transform_2(%arg0: i32) -> (i32, i32) {
    %c0_i32 = arith.constant 0 : i32
    %c0_i32_0 = arith.constant 0 : i32
    %c0_i32_1 = arith.constant 0 : i32
    return %c0_i32, %c0_i32_0 : i32, i32
  }
  func.func @transform_3(%arg0: i32) -> (i32, i32) {
    %c0_i32 = arith.constant 0 : i32
    %c0_i32_0 = arith.constant 0 : i32
    %c0_i32_1 = arith.constant 0 : i32
    return %c0_i32, %c0_i32_0 : i32, i32
  }
  func.func @transform_4(%arg0: i32) -> (i32, i32) {
    %c0_i32 = arith.constant 0 : i32
    %c0_i32_0 = arith.constant 0 : i32
    %c0_i32_1 = arith.constant 0 : i32
    return %c0_i32, %c0_i32_0 : i32, i32
  }
  func.func @transform_5(%arg0: i32) -> (i32, i32) {
    %c0_i32 = arith.constant 0 : i32
    %c0_i32_0 = arith.constant 0 : i32
    %c0_i32_1 = arith.constant 0 : i32
    return %c0_i32, %c0_i32_0 : i32, i32
  }
  func.func @transform_6(%arg0: i32) -> (i32, i32, i32) {
    %c0_i32 = arith.constant 0 : i32
    %c0_i32_0 = arith.constant 0 : i32
    %c0_i32_1 = arith.constant 0 : i32
    return %arg0, %c0_i32, %c0_i32_0 : i32, i32, i32
  }
  func.func @transform_7(%arg0: i32) -> (i32, i32) {
    %c0_i32 = arith.constant 0 : i32
    %c0_i32_0 = arith.constant 0 : i32
    %c0_i32_1 = arith.constant 0 : i32
    return %c0_i32, %c0_i32_0 : i32, i32
  }
  func.func @transform_8(%arg0: i32) -> (i32, i32) {
    %c0_i32 = arith.constant 0 : i32
    %c0_i32_0 = arith.constant 0 : i32
    %c0_i32_1 = arith.constant 0 : i32
    return %c0_i32, %c0_i32_0 : i32, i32
  }
}

</mosaic_0001>

<bundles_post_ra>
// kernel: _lambda_.1
= control target key start
LH: loop header
LB: loop body
LE: loop exit
PB: predicated region body
PF: predicated region fallthrough
CT: control target
= control target key end

     0   :  { %14 = vsyncpa [#allocation3], 0  ;;  %s936_s27 = smov 0   ;;  %s1035_s0 = inlined_call_operand.vmem [shape: f32[8,8,16], index: 0, kind: input, shape index: {}]   ;;  %s1036_s1 = inlined_call_operand.vmem [shape: f32[8,128], index: 1, kind: input, shape index: {}, may-alias: {1,2}]   ;;  %s1037_s2 = inlined_call_operand.vmem [shape: f32[8,128], index: 2, kind: input, shape index: {}, may-alias: {1,2}]   ;;  %s1038_s3 = inlined_call_operand.vmem [shape: f32[16,512], index: 3, kind: input, shape index: {}]   ;;  %s1039_s4 = inlined_call_operand.hbm [shape: f32[128,512], index: 4, kind: input, shape index: {}]   ;;  %s1040_s5 = inlined_call_operand.vmem [shape: f32[1,512], index: 5, kind: input, shape index: {}]   ;;  %s1041_s6 = inlined_call_operand.vmem [shape: f32[8,8,128], index: 6, kind: output, shape index: {0}]   ;;  %s1042_s7 = inlined_call_operand.vmem [shape: f32[8,128], index: 7, kind: output, shape index: {1}]   ;;  %s1043_s8 = inlined_call_operand.vmem [shape: f32[8,128], index: 8, kind: output, shape index: {2}]  }
   0x1 LB: > { %s942_s28 = sadd.s32 4294967295, %s885_s27   ;;  %p805_p0 = scmp.ge.s32.totalorder %s885_s27, 1  ;;  %s885_s27 = sphi %s936_s27, %s20_s27  }
   0x2   : > { %p224_p1 = scmp.lt.s32.totalorder %s885_s27, 9  ;;  %s887_s29 = smov [#allocation2]  }
   0x3   : > { %s245_s30 = sshll.u32 %s887_s29, 4  ;;  %p825_p4 = scmp.eq.s32.totalorder %s942_s28, 0  ;;  %s246_s30 = int_to_ptr.vmem [resolvable:$true] %s245_s30 }
   0x4   : > { %p947_p3 = pnand %p805_p0, %p224_p1  ;;  %s860_s10 = scalar_lea.vmem %s246_s30, 8192 }
   0x5   : > { %p861_p8 = scmp.ne.s32.totalorder %s246_s30, %s860_s10  ;;  %p868_p11 = scmp.lt.s32.totalorder %s246_s30, %s246_s30 }
   0x6   : > { %p821_p5 = pneg %p947_p3  ;;  %p869_p12 = scmp.lt.s32.totalorder %s860_s10, %s860_s10 }
   0x8   : > { %p822_p6 = pnand %p825_p4, %p821_p5  ;;  %p870_p13 = por %p869_p12, %p868_p11 }
   0xa   : > { %p851_p7 = pneg %p822_p6 }
   0xc   : > { %p863_p9 = pnand %p861_p8, %p851_p7 }
   0xe   : > { %p864_p10 = pneg %p863_p9 }
  0x10   : > { %p871_p2 = pnand %p870_p13, %p864_p10 }
  0x12   : > { %874 = shalt.err (!%p871_p2)
}
  0x13   : > { %s888_s11 = smov 512   ;;  %s889_s12 = smov 32  }
  0x14   : > { %824 = dma.hbm_to_vmem [thread:$0]  (!%p822_p6), %s1039_s4, 8192, %s246_s30, [#allocation3], %s888_s11, %s888_s11, %s889_s12  }
  0x15   : > { %271 = sbr.rel (%p947_p3) target bundleno = 315 (0x13b), region = 44 }
  0x1a   : > { %880 = dma.done.wait (%p825_p4), [#allocation3], 8192  }
  0x1b   : > { %882 = vsyncadd (%p825_p4), [#allocation3], 4294959104  ;;  %p303_p0 = scmp.lt.s32.totalorder %s942_s28, 7  ;;  %p1045_p1 = scmp.ne.s32.totalorder %s942_s28, 0 }
  0x1d   : > { %s304_s15 = scalar_select %p303_p0, %s942_s28, 7 }
  0x1e   : > { %314 = sbr.rel (%p1045_p1) target bundleno = 38 (0x26), region = 52 }
  0x1f   : > { %s810_s16 = sshll.u32 %s304_s15, 3 }
  0x20   : > { %s970_s19 = scalar_lea.vmem %s1035_s0, %s810_s16  ;;  %s975_s22 = scalar_lea.vmem %s1041_s6, %s810_s16 }
  0x23   : > { %v315_v0 = vld [vmem:[%s1036_s1] sm:$0xff] }
  0x24   : > { %v317_v1 = vld [vmem:[%s1037_s2] sm:$0xff]  ;;  %316 = vst [vmem:[%s1042_s7] sm:$0xff] %v315_v0 }
  0x25   : > { %318 = vst [vmem:[%s1043_s8] sm:$0xff] %v317_v1 }
  0x26 PF: > { %v391_v2 = vld [vmem:[#allocation2 + $0x1e8] sm:$0xff]  ;;  %v390_v3 = vld [vmem:[#allocation2 + $0x1e0] sm:$0xff]  ;;  %v393_v4 = vld [vmem:[#allocation2 + $0x1f8] sm:$0xff]  ;;  %vm536_vm0 = vcmask 130048  }
  0x27   : > { %394 = vmatprep.subr.mxu0 %v391_v2  ;;  %465 = vmatprep.subr.mxu1 %v393_v4  ;;  %v387_v5 = vld [vmem:[#allocation2 + $0x1c8] sm:$0xff]  ;;  %v392_v6 = vld [vmem:[#allocation2 + $0x1f0] sm:$0xff]  ;;  %v386_v7 = vld [vmem:[#allocation2 + $0x1c0] sm:$0xff] }
  0x28   : > { %395 = vmatpush1.msra.mxu0 %v390_v3  ;;  %466 = vmatpush1.msra.mxu1 %v392_v6  ;;  %v389_v8 = vld [vmem:[#allocation2 + $0x1d8] sm:$0xff]  ;;  %v383_v9 = vld [vmem:[#allocation2 + $0x1a8] sm:$0xff]  ;;  %v388_v10 = vld [vmem:[#allocation2 + $0x1d0] sm:$0xff]  ;;  %v890_v3 = vmov 0.0  }
  0x29   : > { %396 = vmatprep.subr.mxu0 %v387_v5  ;;  %467 = vmatprep.subr.mxu1 %v389_v8  ;;  %v382_v11 = vld [vmem:[#allocation2 + $0x1a0] sm:$0xff]  ;;  %v385_v12 = vld [vmem:[#allocation2 + $0x1b8] sm:$0xff]  ;;  %v379_v13 = vld [vmem:[#allocation2 + $0x188] sm:$0xff] }
  0x2a   : > { %397 = vmatpush1.msra.mxu0 %v386_v7  ;;  %468 = vmatpush1.msra.mxu1 %v388_v10  ;;  %v384_v14 = vld [vmem:[#allocation2 + $0x1b0] sm:$0xff]  ;;  %v381_v15 = vld [vmem:[#allocation2 + $0x198] sm:$0xff]  ;;  %v378_v16 = vld [vmem:[#allocation2 + $0x180] sm:$0xff] }
  0x2b   : > { %398 = vmatprep.subr.mxu0 %v383_v9  ;;  %469 = vmatprep.subr.mxu1 %v385_v12  ;;  %v380_v17 = vld [vmem:[#allocation2 + $0x190] sm:$0xff]  ;;  %v375_v18 = vld [vmem:[#allocation2 + $0x168] sm:$0xff]  ;;  %v377_v19 = vld [vmem:[#allocation2 + $0x178] sm:$0xff] }
  0x2c   : > { %399 = vmatpush1.msra.mxu0 %v382_v11  ;;  %470 = vmatpush1.msra.mxu1 %v384_v14  ;;  %v374_v20 = vld [vmem:[#allocation2 + $0x160] sm:$0xff]  ;;  %v376_v21 = vld [vmem:[#allocation2 + $0x170] sm:$0xff]  ;;  %v371_v22 = vld [vmem:[#allocation2 + $0x148] sm:$0xff] }
  0x2d   : > { %400 = vmatprep.subr.mxu0 %v379_v13  ;;  %471 = vmatprep.subr.mxu1 %v381_v15  ;;  %v373_v23 = vld [vmem:[#allocation2 + $0x158] sm:$0xff]  ;;  %v370_v24 = vld [vmem:[#allocation2 + $0x140] sm:$0xff]  ;;  %v372_v25 = vld [vmem:[#allocation2 + $0x150] sm:$0xff]  ;;  %v684_v13 = vlaneseq }
  0x2e   : > { %401 = vmatpush1.msra.mxu0 %v378_v16  ;;  %472 = vmatpush1.msra.mxu1 %v380_v17  ;;  %v367_v26 = vld [vmem:[#allocation2 + $0x128] sm:$0xff]  ;;  %v369_v27 = vld [vmem:[#allocation2 + $0x138] sm:$0xff]  ;;  %v366_v28 = vld [vmem:[#allocation2 + $0x120] sm:$0xff] }
  0x2f   : > { %402 = vmatprep.subr.mxu0 %v375_v18  ;;  %473 = vmatprep.subr.mxu1 %v377_v19  ;;  %v368_v29 = vld [vmem:[#allocation2 + $0x130] sm:$0xff]  ;;  %v363_v30 = vld [vmem:[#allocation2 + $0x108] sm:$0xff]  ;;  %v365_v31 = vld [vmem:[#allocation2 + $0x118] sm:$0xff]  ;;  %v685_v14 = vshrl.u32 %v684_v13, 7 }
  0x30   : > { %403 = vmatpush1.msra.mxu0 %v374_v20  ;;  %474 = vmatpush1.msra.mxu1 %v376_v21  ;;  %v362_v32 = vld [vmem:[#allocation2 + $0x100] sm:$0xff]  ;;  %v364_v33 = vld [vmem:[#allocation2 + $0x110] sm:$0xff]  ;;  %v359_v34 = vld [vmem:[#allocation2 + $0xe8] sm:$0xff] }
  0x31   : > { %404 = vmatprep.subr.mxu0 %v371_v22  ;;  %475 = vmatprep.subr.mxu1 %v373_v23  ;;  %v361_v35 = vld [vmem:[#allocation2 + $0xf8] sm:$0xff]  ;;  %v358_v36 = vld [vmem:[#allocation2 + $0xe0] sm:$0xff]  ;;  %v360_v37 = vld [vmem:[#allocation2 + $0xf0] sm:$0xff]  ;;  %v686_v16 = vsub.s32 0, %v685_v14  ;;  %v690_v20 = vsub.s32 1, %v685_v14 }
  0x32   : > { %405 = vmatpush1.msra.mxu0 %v370_v24  ;;  %476 = vmatpush1.msra.mxu1 %v372_v25  ;;  %v355_v38 = vld [vmem:[#allocation2 + $0xc8] sm:$0xff]  ;;  %v357_v39 = vld [vmem:[#allocation2 + $0xd8] sm:$0xff]  ;;  %v354_v40 = vld [vmem:[#allocation2 + $0xc0] sm:$0xff]  ;;  %v694_v24 = vsub.s32 2, %v685_v14 }
  0x33   : > { %406 = vmatprep.subr.mxu0 %v367_v26  ;;  %477 = vmatprep.subr.mxu1 %v369_v27  ;;  %v356_v41 = vld [vmem:[#allocation2 + $0xd0] sm:$0xff]  ;;  %v351_v42 = vld [vmem:[#allocation2 + $0xa8] sm:$0xff]  ;;  %v353_v43 = vld [vmem:[#allocation2 + $0xb8] sm:$0xff] }
  0x34   : > { %407 = vmatpush1.msra.mxu0 %v366_v28  ;;  %478 = vmatpush1.msra.mxu1 %v368_v29  ;;  %v350_v44 = vld [vmem:[#allocation2 + $0xa0] sm:$0xff]  ;;  %v352_v45 = vld [vmem:[#allocation2 + $0xb0] sm:$0xff]  ;;  %v347_v46 = vld [vmem:[#allocation2 + $0x88] sm:$0xff] }
  0x35   : > { %408 = vmatprep.subr.mxu0 %v363_v30  ;;  %479 = vmatprep.subr.mxu1 %v365_v31  ;;  %v349_v47 = vld [vmem:[#allocation2 + $0x98] sm:$0xff]  ;;  %v346_v48 = vld [vmem:[#allocation2 + $0x80] sm:$0xff]  ;;  %v348_v49 = vld [vmem:[#allocation2 + $0x90] sm:$0xff] }
  0x36   : > { %409 = vmatpush1.msra.mxu0 %v362_v32  ;;  %480 = vmatpush1.msra.mxu1 %v364_v33  ;;  %v343_v50 = vld [vmem:[#allocation2 + $0x68] sm:$0xff]  ;;  %v345_v51 = vld [vmem:[#allocation2 + $0x78] sm:$0xff]  ;;  %v342_v52 = vld [vmem:[#allocation2 + $0x60] sm:$0xff] }
  0x37   : > { %410 = vmatprep.subr.mxu0 %v359_v34  ;;  %481 = vmatprep.subr.mxu1 %v361_v35  ;;  %v344_v53 = vld [vmem:[#allocation2 + $0x70] sm:$0xff]  ;;  %v339_v54 = vld [vmem:[#allocation2 + $0x48] sm:$0xff]  ;;  %v341_v55 = vld [vmem:[#allocation2 + $0x58] sm:$0xff]  ;;  %v698_v35 = vsub.s32 3, %v685_v14 }
  0x38   : > { %411 = vmatpush1.msra.mxu0 %v358_v36  ;;  %482 = vmatpush1.msra.mxu1 %v360_v37  ;;  %v338_v56 = vld [vmem:[#allocation2 + $0x40] sm:$0xff]  ;;  %v340_v57 = vld [vmem:[#allocation2 + $0x50] sm:$0xff]  ;;  %v335_v58 = vld [vmem:[#allocation2 + $0x28] sm:$0xff] }
  0x39   : > { %412 = vmatprep.subr.mxu0 %v355_v38  ;;  %483 = vmatprep.subr.mxu1 %v357_v39  ;;  %v337_v59 = vld [vmem:[#allocation2 + $0x38] sm:$0xff]  ;;  %v334_v60 = vld [vmem:[#allocation2 + $0x20] sm:$0xff]  ;;  %v336_v61 = vld [vmem:[#allocation2 + $0x30] sm:$0xff] }
  0x3a   : > { %413 = vmatpush1.msra.mxu0 %v354_v40  ;;  %484 = vmatpush1.msra.mxu1 %v356_v41  ;;  %v331_v62 = vld [vmem:[#allocation2 + $0x8] sm:$0xff]  ;;  %v330_v63 = vld [vmem:[#allocation2] sm:$0xff]  ;;  %v333_v0 = vld [vmem:[#allocation2 + $0x18] sm:$0xff] }
  0x3b   : > { %414 = vmatprep.subr.mxu0 %v351_v42  ;;  %485 = vmatprep.subr.mxu1 %v353_v43  ;;  %v319_v1 = vld [vmem:[%s1042_s7] sm:$0xff]  ;;  %v332_v2 = vld [vmem:[#allocation2 + $0x10] sm:$0xff]  ;;  %v327_v4 = vld [vmem:[%s1038_s3 + $0x28] sm:$0xff] }
  0x3c   : > { %415 = vmatpush1.msra.mxu0 %v350_v44  ;;  %486 = vmatpush1.msra.mxu1 %v352_v45  ;;  %v326_v5 = vld [vmem:[%s1038_s3 + $0x20] sm:$0xff]  ;;  %v329_v6 = vld [vmem:[%s1038_s3 + $0x38] sm:$0xff]  ;;  %v323_v7 = vld [vmem:[%s1038_s3 + $0x8] sm:$0xff] }
  0x3d   : > { %416 = vmatprep.subr.mxu0 %v347_v46  ;;  %487 = vmatprep.subr.mxu1 %v349_v47  ;;  %v328_v8 = vld [vmem:[%s1038_s3 + $0x30] sm:$0xff]  ;;  %v322_v9 = vld [vmem:[%s1038_s3] sm:$0xff]  ;;  %v325_v10 = vld [vmem:[%s1038_s3 + $0x18] sm:$0xff] }
  0x3e   : > { %417 = vmatpush1.msra.mxu0 %v346_v48  ;;  %488 = vmatpush1.msra.mxu1 %v348_v49  ;;  %v321_v11 = vld [vmem:[%s970_s19] sm:$0xff]  ;;  %v324_v12 = vld [vmem:[%s1038_s3 + $0x10] sm:$0xff] }
  0x3f   : > { %418 = vmatprep.subr.mxu0 %v343_v50  ;;  %489 = vmatprep.subr.mxu1 %v345_v51  ;;  %v682_v19 = vld [vmem:[%s1040_s5] sm:$0xf] }
  0x40   : > { %419 = vmatpush1.msra.mxu0 %v342_v52  ;;  %490 = vmatpush1.msra.mxu1 %v344_v53  ;;  %v687_v22 = vrot.slane %v682_v19, %v686_v16  ;;  %v691_v26 = vrot.slane %v682_v19, %v690_v20  ;;  %v695_v32 = vrot.slane %v682_v19, %v694_v24  ;;  %v320_v45 = vld [vmem:[%s1043_s8] sm:$0xff] }
  0x41   : > { %420 = vmatprep.subr.mxu0 %v339_v54  ;;  %491 = vmatprep.subr.mxu1 %v341_v55  ;;  %v699_v38 = vrot.slane %v682_v19, %v698_v35 }
  0x42   : > { %421 = vmatpush1.msra.mxu0 %v338_v56  ;;  %492 = vmatpush1.msra.mxu1 %v340_v57 }
  0x43   : > { %422 = vmatprep.subr.mxu0 %v335_v58  ;;  %493 = vmatprep.subr.mxu1 %v337_v59 }
  0x44   : > { %423 = vmatpush1.msra.mxu0 %v334_v60  ;;  %494 = vmatpush1.msra.mxu1 %v336_v61 }
  0x45   : > { %424 = vmatprep.subr.mxu0 %v331_v62  ;;  %458 = vmatprep.mubr.f32.mxu0 %v890_v3 }
  0x46   : > { %425 = vmatpush1.msra.mxu0 %v330_v63  ;;  %495 = vmatprep.subr.mxu1 %v333_v0 }
  0x47   : > { %459 = vmatmul.mubr.f32.vlgmr.msra.gmra.mxu0 %v319_v1  ;;  %496 = vmatpush1.msra.mxu1 %v332_v2 }
  0x48   : > { %529 = vmatprep.mubr.f32.mxu1 %v890_v3  ;;  %568 = vmatprep.subr.mxu0 %v327_v4 }
  0x49   : > { %530 = vmatmul.mubr.f32.vlgmr.msra.gmra.mxu1 %v319_v1  ;;  %569 = vmatpush1.msra.mxu0 %v326_v5 }
  0x4a   : > { %639 = vmatprep.subr.mxu1 %v329_v6  ;;  %570 = vmatprep.subr.mxu0 %v323_v7 }
  0x4b   : > { %640 = vmatpush1.msra.mxu1 %v328_v8  ;;  %571 = vmatpush1.msra.mxu0 %v322_v9 }
  0x4c   : > { %604 = vmatprep.mubr.f32.mxu0 %v890_v3  ;;  %641 = vmatprep.subr.mxu1 %v325_v10 }
  0x4d   : > { %813 = vmatmul.mubr.msk.f32.vlgmr.msra.gmra.mxu0 %vm536_vm0, %v321_v11  ;;  %642 = vmatpush1.msra.mxu1 %v324_v12 }
  0x4e   : > { %675 = vmatprep.mubr.f32.mxu1 %v890_v3 }
  0x4f   : > { %814 = vmatmul.mubr.msk.f32.vlgmr.msra.gmra.mxu1 %vm536_vm0, %v321_v11 }
 0x107   : > { %v460_v15 = vpop.f32.mrf.mxu0 }
 0x109   : > { %v531_v17 = vpop.f32.mrf.mxu1  ;;  %v462_v18 = vpop.f32.mrf.mxu0 }
 0x10b   : > { %v533_v21 = vpop.f32.mrf.mxu1 }
 0x10d   : > { %v606_v23 = vpop.f32.mrf.mxu0 }
 0x10e   : > { %v607_v25 = vadd.f32 %v606_v23, %v460_v15 }
 0x10f   : > { %v608_v27 = vpop.f32.mrf.mxu0  ;;  %v677_v29 = vpop.f32.mrf.mxu1 }
 0x110   : > { %v704_v28 = vadd.f32 %v687_v22, %v607_v25  ;;  %v609_v30 = vadd.f32 %v608_v27, %v462_v18  ;;  %v678_v31 = vadd.f32 %v677_v29, %v531_v17 }
 0x111   : > { %v679_v36 = vpop.f32.mrf.mxu1 }
 0x112   : > { %839 = vtanh.f32 %v704_v28  ;;  %v705_v33 = vadd.f32 %v691_v26, %v609_v30  ;;  %v706_v34 = vadd.f32 %v695_v32, %v678_v31  ;;  %v680_v37 = vadd.f32 %v679_v36, %v533_v21 }
 0x114   : > { %841 = vtanh.f32 %v705_v33  ;;  %v707_v40 = vadd.f32 %v699_v38, %v680_v37 }
 0x115   : > { %843 = vtanh.f32 %v706_v34 }
 0x116   : > { %845 = vtanh.f32 %v707_v40 }
 0x11f   : > { %v840_v39 = vpop.eup %839 }
 0x120   : > { %v709_v41 = vadd.f32 1.0, %v840_v39 }
 0x121   : > { %v842_v42 = vpop.eup %841 }
 0x122   : > { %v710_v43 = vmul.f32 0.5, %v709_v41  ;;  %v712_v44 = vadd.f32 1.0, %v842_v42  ;;  %v844_v47 = vpop.eup %843 }
 0x123   : > { %v846_v51 = vpop.eup %845 }
 0x124   : > { %v713_v46 = vmul.f32 0.5, %v712_v44  ;;  %v719_v49 = vmul.f32 %v844_v47, %v710_v43  ;;  %v716_v52 = vadd.f32 1.0, %v846_v51 }
 0x126   : > { %v718_v48 = vmul.f32 %v713_v46, %v320_v45  ;;  %v717_v53 = vmul.f32 0.5, %v716_v52 }
 0x128   : > { %v720_v50 = vadd.f32 %v719_v49, %v718_v48 }
 0x12a   : > { %847 = vtanh.f32 %v720_v50  ;;  %723 = vst [vmem:[%s1043_s8] sm:$0xff] %v720_v50 }
 0x137   : > { %v848_v54 = vpop.eup %847 }
 0x138   : > { %v722_v55 = vmul.f32 %v848_v54, %v717_v53 }
 0x13a   : > { %724 = vst [vmem:[%s1042_s7] sm:$0xff] %v722_v55  ;;  %725 = vst [vmem:[%s975_s22] sm:$0xff] %v722_v55 }
 0x13b PF: > { %s20_s27 = sadd.s32 1, %s885_s27  }
 0x13c   : > { %p17_p2 = scmp.ge.s32.totalorder %s20_s27, 10  }
 0x13e   :  { %19 = sbr.rel (!%p17_p2) target bundleno = 1 (0x1), region = 99 }
 0x143   :  { %757 = vsyncpa [#allocation3], 1 }
 0x144   :  { %759 = vsyncpa [#allocation3 + $0x1], 1 }

</bundles_post_ra>
